<compile_context>
chip_gen: v5e
topology: v5e:2x2
jax: 0.10.0
libtpu: 0.0.40
codegen_flags: <defaults>
</compile_context>

<pallas_src>
import jax
import jax.numpy as jnp
from jax.experimental import pallas as pl
from jax.experimental.pallas import tpu as pltpu


def _prelu_kernel(w_ref, x_ref, o_ref):
    # w_ref: (C,) slopes in SMEM;  x_ref/o_ref: (1, 1, tR, lane) VMEM tiles
    # of a single (n, c) slice, so the slope for this tile is one scalar.
    c = pl.program_id(1)
    alpha = w_ref[c]                       # scalar SMEM read; VPU splats it
    x = x_ref[...]
    o_ref[...] = jnp.where(x > 0, x, alpha * x).astype(o_ref.dtype)


def prelu_pallas(x, weight, *, target_tile_bytes=2 * 1024 * 1024):
    """PReLU forward. x: (N, C, H, W), weight: (C,) (num_params == C)."""
    N, C, H, W = x.shape
    assert weight.shape == (C,)
    L = H * W
    itemsize = jnp.dtype(x.dtype).itemsize

    # Lane-dense inner width: the largest of these that divides H*W,
    # otherwise fall back to 128 and pad the flattened spatial dim.
    lane = 128
    for cand in (2048, 1024, 512, 256, 128):
        if L % cand == 0:
            lane = cand
            break
    L_pad = pl.cdiv(L, lane) * lane
    rows = L_pad // lane

    xf = x.reshape(N, C, L)
    if L_pad != L:
        # Only hit for awkward H*W (not a multiple of 128). PReLU(0) == 0, so
        # zero padding is harmless; it is sliced off after the kernel.
        xf = jnp.pad(xf, ((0, 0), (0, 0), (0, L_pad - L)))
    x4 = xf.reshape(N, C, rows, lane)

    # Row tile: multiple of 8, sized for ~target_tile_bytes. With double
    # buffering of input + output this is <= ~8 MiB of VMEM -> fits the
    # default scoped limit on every generation (no vmem_limit_bytes needed).
    tR = max(8, (target_tile_bytes // (lane * itemsize)) // 8 * 8)
    if rows <= tR:
        tR = rows                          # full-dim block is always legal
    grid = (N, C, pl.cdiv(rows, tR))

    tile_spec = pl.BlockSpec((1, 1, tR, lane), lambda n, c, r: (n, c, r, 0))

    out4 = pl.pallas_call(
        _prelu_kernel,
        out_shape=jax.ShapeDtypeStruct((N, C, rows, lane), x.dtype),
        grid=grid,
        in_specs=[
            pl.BlockSpec(memory_space=pltpu.MemorySpace.SMEM),  # weight (C,)
            tile_spec,                                          # x tiles
        ],
        out_specs=tile_spec,
        compiler_params=pltpu.CompilerParams(
            # Purely elementwise: every grid axis is independent.
            dimension_semantics=("parallel", "parallel", "parallel"),
        ),
    )(weight, x4)

    out = out4.reshape(N, C, L_pad)
    if L_pad != L:
        out = out[:, :, :L]
    return out.reshape(N, C, H, W)


def _ref_prelu(x, weight):
    return jnp.where(x > 0, x, weight[None, :, None, None] * x)


if __name__ == "__main__":
    # Module: LayerPReLU(num_params=3) -> nn.PReLU(3). Default init is 0.25
    # for every channel; distinct values are used so per-channel indexing is
    # actually exercised.
    num_params = 3
    N, C, H, W = 2, num_params, 16, 16

    key = jax.random.PRNGKey(0)
    x = jax.random.normal(key, (N, C, H, W), dtype=jnp.float32)
    weight = jnp.array([0.25, 0.1, 0.6], dtype=jnp.float32)

    y = jax.block_until_ready(prelu_pallas(x, weight))
    assert jnp.allclose(y, _ref_prelu(x, weight), atol=1e-6), "mismatch (small)"

    # Extra sanity: multi-tile grid along the row axis (smaller tile budget).
    k1, k2 = jax.random.split(key)
    x2 = jax.random.normal(k1, (1, C, 256, 128), dtype=jnp.float32)
    y2 = jax.block_until_ready(
        prelu_pallas(x2, weight, target_tile_bytes=64 * 1024))
    assert jnp.allclose(y2, _ref_prelu(x2, weight), atol=1e-6), "mismatch (tiled)"

    # Extra sanity: H*W not a multiple of 128 -> padding + slice-back path.
    x3 = jax.random.normal(k2, (2, C, 13, 11), dtype=jnp.float32)
    y3 = jax.block_until_ready(prelu_pallas(x3, weight))
    assert jnp.allclose(y3, _ref_prelu(x3, weight), atol=1e-6), "mismatch (padded)"

    print("KERNEL_OK")
</pallas_src>

<mosaic_0001>
module attributes {stable_mosaic.version = 11 : i64} {
  func.func @_prelu_kernel(%arg0: i32, %arg1: i32, %arg2: i32, %arg3: memref<3xf32, #tpu.memory_space<smem>>, %arg4: memref<1x1x1x256xf32, #tpu.memory_space<vmem>>, %arg5: memref<1x1x1x256xf32, #tpu.memory_space<vmem>>) attributes {dimension_semantics = [#tpu.dimension_semantics<parallel>, #tpu.dimension_semantics<parallel>, #tpu.dimension_semantics<parallel>], iteration_bounds = array<i64: 2, 3, 1>, scalar_prefetch = 0 : i64, scratch_operands = 0 : i64, tpu.core_type = #tpu.core_type<tc>, window_params = [{transform_indices = @transform_0, window_bounds = array<i64: 3>}, {transform_indices = @transform_1, window_bounds = array<i64: 1, 1, 1, 256>}, {transform_indices = @transform_2, window_bounds = array<i64: 1, 1, 1, 256>}]} {
    %0 = arith.index_cast %arg1 : i32 to index
    %1 = memref.load %arg3[%0] : memref<3xf32, #tpu.memory_space<smem>>
    %c0 = arith.constant 0 : index
    %c0_0 = arith.constant 0 : index
    %c0_1 = arith.constant 0 : index
    %c0_2 = arith.constant 0 : index
    %2 = vector.load %arg4[%c0, %c0_0, %c0_1, %c0_2] : memref<1x1x1x256xf32, #tpu.memory_space<vmem>>, vector<1x1x1x256xf32>
    %cst = arith.constant 0.000000e+00 : f32
    %3 = vector.broadcast %cst : f32 to vector<1x1x1x256xf32>
    %4 = arith.cmpf ogt, %2, %3 : vector<1x1x1x256xf32>
    %5 = vector.broadcast %1 : f32 to vector<1x1x1x256xf32>
    %6 = arith.mulf %5, %2 : vector<1x1x1x256xf32>
    %7 = arith.select %4, %2, %6 : vector<1x1x1x256xi1>, vector<1x1x1x256xf32>
    %c0_3 = arith.constant 0 : index
    %c0_4 = arith.constant 0 : index
    %c0_5 = arith.constant 0 : index
    %c0_6 = arith.constant 0 : index
    %8 = vector.load %arg5[%c0_3, %c0_4, %c0_5, %c0_6] : memref<1x1x1x256xf32, #tpu.memory_space<vmem>>, vector<1x1x1x256xf32>
    tpu.vector_store %arg5[%c0_3, %c0_4, %c0_5, %c0_6], %7 {strides = array<i32>} : memref<1x1x1x256xf32, #tpu.memory_space<vmem>>, vector<1x1x1x256xf32>,
    return
  }
  func.func @transform_0(%arg0: i32, %arg1: i32, %arg2: i32) -> i32 {
    %c0_i32 = arith.constant 0 : i32
    %c0_i32_0 = arith.constant 0 : i32
    return %c0_i32 : i32
  }
  func.func @transform_1(%arg0: i32, %arg1: i32, %arg2: i32) -> (i32, i32, i32, i32) {
    %c0_i32 = arith.constant 0 : i32
    %c0_i32_0 = arith.constant 0 : i32
    return %arg0, %arg1, %arg2, %c0_i32 : i32, i32, i32, i32
  }
  func.func @transform_2(%arg0: i32, %arg1: i32, %arg2: i32) -> (i32, i32, i32, i32) {
    %c0_i32 = arith.constant 0 : i32
    %c0_i32_0 = arith.constant 0 : i32
    return %arg0, %arg1, %arg2, %c0_i32 : i32, i32, i32, i32
  }
}

</mosaic_0001>

<bundles_post_ra>
// kernel: tpu_custom_call.1
= control target key start
LH: loop header
LB: loop body
LE: loop exit
PB: predicated region body
PF: predicated region fallthrough
CT: control target
= control target key end

     0   :  { %s786_s0 = inlined_call_operand.hbm [shape: f32[3], index: 0, kind: input, shape index: {}]   ;;  %s787_s1 = inlined_call_operand.hbm [shape: f32[2,3,1,256], index: 1, kind: input, shape index: {}]   ;;  %s788_s2 = inlined_call_operand.hbm [shape: f32[2,3,1,256], index: 2, kind: output, shape index: {}]  }
   0x1   :  { %793 = sst [smem:[#allocation15_spill]] %s786_s0 }
   0x2   :  { %7 = vsyncpa [#allocation5], 0 }
   0x3   :  { %8 = vsyncpa [#allocation3], 0 }
   0x4   :  { %10 = vsyncpa [#allocation3 + $0x1], 0 }
   0x5   :  { %11 = vsyncpa [#allocation4], 0 }
   0x6   :  { %13 = vsyncpa [#allocation4 + $0x1], 0  ;;  %s612_s9 = smov 0   ;;  %s614_s10 = smov 0  }
   0x7   :  { %s616_s11 = smov 0   ;;  %s618_s12 = smov 0  }
   0x8   :  { %s620_s13 = smov 0   ;;  %s622_s14 = smov 0  }
   0x9   :  { %s624_s15 = smov 0   ;;  %s626_s16 = smov 0  }
   0xa LB: > { %794 = sst [smem:[#allocation11_spill]] %s566_s9  ;;  %s341_s17 = sadd.s32 4294967295, %s594_s16   ;;  %s594_s16 = sphi %s626_s16, %s19_s16   ;;  %s590_s15 = sphi %s624_s15, %s816_s15   ;;  %s586_s14 = sphi %s622_s14, %s815_s14   ;;  %s582_s13 = sphi %s620_s13, %s814_s13   ;;  %s578_s12 = sphi %s618_s12, %s813_s12   ;;  %s574_s11 = sphi %s616_s11, %s812_s11   ;;  %s570_s10 = sphi %s614_s10, %s811_s10   ;;  %s566_s9 = sphi %s612_s9, %s810_s9  }
   0xb   : > { %s342_s18 = sadd.s32 4294967294, %s594_s16   ;;  %p83_p0 = scmp.ne.s32.totalorder %s570_s10, %s566_s9 }
   0xc   : > { %p656_p1 = scmp.eq.s32.totalorder %s341_s17, 0  ;;  %p660_p2 = scmp.eq.s32.totalorder %s341_s17, 5 }
   0xd   : > { %p117_p3 = scmp.eq.s32.totalorder %s342_s18, 5  ;;  %p343_p5 = scmp.ge.s32.totalorder %s594_s16, 1 }
   0xe   : > { %p666_p4 = por %p656_p1, %p83_p0  ;;  %p124_p7 = scmp.lt.s32.totalorder %s594_s16, 7 }
   0xf   : > { %p671_p6 = por %p117_p3, %p83_p0  ;;  %s800_s0 = sld [smem:[#allocation15_spill]] }
  0x10   : > { %p679_p8 = pnand %p343_p5, %p124_p7  ;;  %s34_s27 = sadd.s32 1, %s586_s14 }
  0x11   : > { %s798_s22 = scalar_select %p671_p6, 1, 0 }
  0x12   : > { %p366_p9 = pneg %p679_p8  ;;  %s596_s28 = smov [#allocation2]  }
  0x13   : > { %799 = sst [smem:[#allocation12_spill]] %s798_s22  ;;  %p36_p11 = scmp.ge.s32.totalorder %s34_s27, 3 }
  0x14   : > { %p367_p10 = pnand %p366_p9, %p656_p1  ;;  %s38_s29 = sadd.s32 1, %s590_s15 }
  0x15   : > { %s136_s25 = sshll.u32 %s800_s0, 4  ;;  %s70_s30 = sadd.s32 1, %s574_s11  ;;  %s137_s25 = int_to_ptr.hbm [resolvable:$true] %s136_s25 }
  0x16   : > { %369 = dma.hbm_to_smem (!%p367_p10), %s137_s25, 16, %s596_s28, [#allocation5]  }
  0x17   : > { %p77_p12 = scmp.ne.s32.totalorder %s574_s11, %s570_s10  ;;  %s818_s27 = smov (%p36_p11, %s34_s27), 0 }
  0x18   : > { %802 = sst [smem:[#allocation13_spill]] %s818_s27  ;;  %s820_s29 = smov (!%p36_p11, %s38_s29), %s590_s15 }
  0x19   : > { %s64_s3 = ssub.s32 %s586_s14, %s818_s27  ;;  %p78_p13 = scmp.eq.s32.totalorder %s594_s16, 0 }
  0x1a   : > { %p40_p0 = scmp.ge.s32.totalorder %s820_s29, 2  ;;  %p700_p3 = por %p660_p2, %p77_p12 }
  0x1b   : > { %p704_p5 = por %p78_p13, %p77_p12  ;;  %p379_p7 = scmp.lt.s32.totalorder %s594_s16, 6 }
  0x1c   : > { %s822_s29 = smov (%p40_p0, %s820_s29), 0  ;;  %s147_s6 = sand.u32 1, %s574_s11  }
  0x1d   : > { %805 = sst [smem:[#allocation14_spill]] %s822_s29  ;;  %s347_s7 = sshll.u32 %s586_s14, 1 }
  0x1e   : > { %s63_s8 = ssub.s32 %s590_s15, %s822_s29  ;;  %s346_s18 = sshll.u32 %s147_s6, 1 }
  0x1f   : > { %s65_s17 = sor.u32 %s64_s3, %s63_s8  ;;  %s356_s20 = smul.u32 6, %s590_s15 }
  0x20   : > { %p68_p9 = scmp.eq.s32.totalorder %s65_s17, 0  ;;  %s151_s23 = scalar_lea.vmem [#allocation6], %s346_s18 }
  0x21   : > { %s163_s24 = sshll.u32 %s151_s23, 4  ;;  %s158_s28 = sadd.s32 %s356_s20, %s347_s7  ;;  %s164_s24 = int_to_ptr.vmem [resolvable:$true] %s163_s24 }
  0x22   : > { %s717_s25 = scalar_select %p68_p9, %s574_s11, %s70_s30  }
  0x23   : > { %s159_s22 = scalar_lea.hbm %s787_s1, %s158_s28  ;;  %p371_p2 = pnand %p379_p7, %p704_p5 }
  0x24   : > { %s161_s9 = sshll.u32 %s159_s22, 4  ;;  %s148_s29 = scalar_lea.sflag [#allocation3], %s147_s6  ;;  %s162_s9 = int_to_ptr.hbm [resolvable:$true] %s161_s9 }
  0x25   : > { %373 = dma.hbm_to_vmem [thread:$0]  (!%p371_p2), %s162_s9, 32, %s164_s24, %s148_s29  }
  0x26   : > { %172 = sbr.rel (%p679_p8) target bundleno = 68 (0x44), region = 28 }
  0x2b   : > { %553 = dma.done.wait (%p656_p1), [#allocation5], 16  }
  0x2c   : > { %555 = vsyncadd (%p656_p1), [#allocation5], 4294967280  ;;  %s733_s0 = sand.u32 1, %s570_s10  }
  0x2d   : > { %s350_s27 = sshll.u32 %s733_s0, 1  ;;  %s180_s22 = scalar_lea.sflag [#allocation3], %s733_s0 }
  0x2e   : > { %s183_s30 = scalar_lea.vmem [#allocation6], %s350_s27 }
  0x2f   : > { %557 = dma.done.wait (%p666_p4), %s180_s22, 32  }
  0x30   : > { %559 = vsyncadd (%p666_p4), %s180_s22, 4294967264 }
  0x31   : > { %189 = sfence }
  0x32   : > { %s206_s9 = sld [smem:[#allocation2 + %s578_s12]]  ;;  %s353_s19 = sshll.u32 %s578_s12, 1  ;;  %v207_v0 = vld [vmem:[%s183_s30] sm:$0x3]  ;;  %v212_v1 = vlaneseq }
  0x33   : > { %s357_s26 = smul.u32 6, %s582_s13  ;;  %s205_s29 = scalar_lea.vmem [#allocation7], %s350_s27  ;;  %vm208_vm0 = vcmp.gt.f32.partialorder %v207_v0, 0.0 }
  0x34   : > { %s234_s3 = sshll.u32 %s205_s29, 4  ;;  %vm214_vm1 = vcmp.lt.s32.totalorder %v212_v1, 256  ;;  %s218_s12 = scalar_lea.sflag [#allocation4], %s733_s0  ;;  %s235_s3 = int_to_ptr.vmem [resolvable:$true] %s234_s3 }
  0x35   : > { %s231_s5 = sadd.s32 %s357_s26, %s353_s19  ;;  %s512_s23 = scalar_lea.hbm %s788_s2, 12 }
  0x36   : > { %s232_s21 = scalar_lea.hbm %s788_s2, %s231_s5 }
  0x37   : > { %s236_s8 = sshll.u32 %s232_s21, 4  ;;  %s237_s8 = int_to_ptr.hbm [resolvable:$true] %s236_s8 }
  0x38   : > { %v209_v2 = vstv %s206_s9  ;;  %s506_s17 = sshra.s32 %s237_s8, 4  ;;  %s507_s17 = int_to_ptr.hbm [resolvable:$true] %s506_s17 }
  0x39   : > { %v210_v3 = vmul.f32 %v209_v2, %v207_v0  ;;  %s508_s13 = scalar_lea.hbm %s507_s17, 2  ;;  %p513_p10 = scmp.lt.s32.totalorder %s507_s17, %s788_s2 }
  0x3a   : > { %p509_p1 = scmp.ne.s32.totalorder %s507_s17, %s508_s13  ;;  %p514_p11 = scmp.lt.s32.totalorder %s512_s23, %s508_s13 }
  0x3b   : > { %v211_v4 = vsel %vm208_vm0, %v207_v0, %v210_v3 }
  0x3c   : > { %216 = vst.msk [vmem:[%s205_s29] sm:$0x3] %vm214_vm1, %v211_v4  ;;  %p510_p4 = pnand %p509_p1, %p700_p3  ;;  %p515_p12 = por %p514_p11, %p513_p10 }
  0x3e   : > { %p511_p8 = pneg %p510_p4 }
  0x40   : > { %p516_p13 = pnand %p515_p12, %p511_p8 }
  0x42   : > { %519 = shalt.err (!%p516_p13)
}
  0x43   : > { %364 = dma.vmem_to_hbm [thread:$0]  (%p700_p3), %s235_s3, 32, %s237_s8, %s218_s12  }
  0x44 PF: > { %s806_s0 = sld [smem:[#allocation11_spill]]  ;;  %p381_p0 = scmp.ge.s32.totalorder %s594_s16, 2 }
  0x46   : > { %p375_p5 = pnand %p381_p0, %p671_p6 }
  0x48   : > { %p376_p7 = pneg %p375_p5 }
  0x4a   : > { %s248_s22 = sand.u32 1, %s806_s0  }
  0x4b   : > { %s249_s30 = scalar_lea.sflag [#allocation4], %s248_s22 }
  0x4c   : > { %561 = dma.done.wait (%p376_p7), %s249_s30, 32  }
  0x4d   : > { %563 = vsyncadd (%p376_p7), %s249_s30, 4294967264  ;;  %s19_s16 = sadd.s32 1, %s594_s16   ;;  %s808_s4 = sld [smem:[#allocation13_spill]] }
  0x4e   : > { %p16_p9 = scmp.ge.s32.totalorder %s19_s16, 8   ;;  %s809_s19 = sld [smem:[#allocation14_spill]] }
  0x4f   : > { %s810_s9 = smov %s570_s10  ;;  %s811_s10 = smov %s574_s11 }
  0x50   : > { %s812_s11 = smov %s717_s25  ;;  %s813_s12 = smov %s586_s14 }
  0x51   : > { %s814_s13 = smov %s590_s15  ;;  %18 = sbr.rel (!%p16_p9) target bundleno = 10 (0xa), region = 78 }
  0x53   : > { %s815_s14 = smov %s808_s4 }
  0x54   : > { %s816_s15 = smov %s809_s19 }
  0x56   :  { %255 = vsyncpa [#allocation3], 1 }
  0x57   :  { %257 = vsyncpa [#allocation3 + $0x1], 1 }
  0x58   :  { %258 = vsyncpa [#allocation4], 1 }
  0x59   :  { %260 = vsyncpa [#allocation4 + $0x1], 1 }
  0x5a   :  { %261 = vsyncpa [#allocation5], 1 }
  0x5b   :  { %263 = vsyncpa [#allocation5 + $0x1], 1 }

</bundles_post_ra>
